<compile_context>
chip_gen: v5e
topology: v5e:2x2
jax: 0.10.0
libtpu: 0.0.40
codegen_flags: <defaults>
</compile_context>

<pallas_src>
import jax
import jax.numpy as jnp
from jax.experimental import pallas as pl
from jax.experimental.pallas import tpu as pltpu


ATOM_PAD = 16        # 14 atoms zero-padded to 16 sublanes
VOCAB = 33           # ESM alphabet size; logits[:, 4:24] selects the 20 amino acids
VOCAB_PAD = 128      # lane-dense padded vocab for the output store


def _round_up(x, m):
    return ((x + m - 1) // m) * m


# ----------------------------- Pallas kernels -----------------------------

def _encoder_sum_kernel(x_ref, w_ref, b_ref, o_ref):
    """Fused surrogate encoder + atom-sum for one residue tile.

    x:[T, Ap, H] bf16, w:[H, H] bf16, b:[1, H] f32  ->  o:[T, H] f32
    y = x + relu(x @ W + b) per atom row (f32 epilogue), then sum over the atom axis.
    Pad atom rows of x are exactly zero, so their contribution is relu(b) each;
    subtracting (ATOM_PAD-14)*relu(b) is an exact correction (no iota/select mask).
    """
    x = x_ref[...]                                         # bf16
    t, ap, h = x.shape
    x2 = x.reshape(t * ap, h)
    mm = jnp.dot(x2, w_ref[...], preferred_element_type=jnp.float32) + b_ref[...]
    y = x2.astype(jnp.float32) + jnp.maximum(mm, 0.0)      # residual + ReLU in f32
    o = jnp.sum(y.reshape(t, ap, h), axis=1)               # unmasked atom sum
    o_ref[...] = o - (ATOM_PAD - 14) * jnp.maximum(b_ref[...], 0.0)


def fused_encoder_sum(res_H_pad, w_bf16, b, *, tile=64):
    """res_H_pad:[N,16,H] (any float dtype) -> h_residue:[N,H] f32."""
    n, ap, h = res_H_pad.shape
    tile = min(tile, _round_up(n, 8))
    n_pad = _round_up(n, tile)
    x = res_H_pad.astype(jnp.bfloat16)                     # halve the dominant DMA stream
    if n_pad != n:
        x = jnp.pad(x, ((0, n_pad - n), (0, 0), (0, 0)))   # pad residues are exact zeros
    out = pl.pallas_call(
        _encoder_sum_kernel,
        out_shape=jax.ShapeDtypeStruct((n_pad, h), jnp.float32),
        grid_spec=pltpu.PrefetchScalarGridSpec(
            num_scalar_prefetch=0, grid=(n_pad // tile,),
            in_specs=[pl.BlockSpec((tile, ap, h), lambda i: (i, 0, 0)),
                      pl.BlockSpec((h, h), lambda i: (0, 0)),     # weight VMEM-resident
                      pl.BlockSpec((1, h), lambda i: (0, 0))],
            out_specs=pl.BlockSpec((tile, h), lambda i: (i, 0))),
        compiler_params=pltpu.CompilerParams(
            dimension_semantics=("parallel",)),
        # TODO(synk): at realistic sizes (H~1280, N_res~hundreds) keep tile<=32-64 on v7x
        # (64 MiB VMEM) and set vmem_limit_bytes explicitly; 64-128 on v6e; <=32 on v5e.
    )(x, w_bf16, b.reshape(1, h).astype(jnp.float32))
    return out[:n]


def _esm_logits_kernel(tok_ref, feat_ref, w_ref, b_ref, o_ref):
    """logits = (tok + feats) @ W_pad + b_pad ; lane-dense 128-wide output store."""
    h = (tok_ref[...].astype(jnp.float32)
         + feat_ref[...].astype(jnp.float32)).astype(jnp.bfloat16)
    o_ref[...] = jnp.dot(h, w_ref[...],
                         preferred_element_type=jnp.float32) + b_ref[...]


def fused_esm_logits(tok_bf16, feat_bf16, w_pad_bf16, b_pad, *, tile=256):
    """tok/feat:[M,H] bf16 (M multiple of 8) -> logits:[M, VOCAB_PAD] f32."""
    m, h = tok_bf16.shape
    v = w_pad_bf16.shape[1]
    tile = min(tile, m)
    m_pad = _round_up(m, tile)
    if m_pad != m:
        tok_bf16 = jnp.pad(tok_bf16, ((0, m_pad - m), (0, 0)))
        feat_bf16 = jnp.pad(feat_bf16, ((0, m_pad - m), (0, 0)))
    out = pl.pallas_call(
        _esm_logits_kernel,
        out_shape=jax.ShapeDtypeStruct((m_pad, v), jnp.float32),
        grid_spec=pltpu.PrefetchScalarGridSpec(
            num_scalar_prefetch=0, grid=(m_pad // tile,),
            in_specs=[pl.BlockSpec((tile, h), lambda i: (i, 0)),
                      pl.BlockSpec((tile, h), lambda i: (i, 0)),
                      pl.BlockSpec((h, v), lambda i: (0, 0)),      # weight VMEM-resident
                      pl.BlockSpec((1, v), lambda i: (0, 0))],
            out_specs=pl.BlockSpec((tile, v), lambda i: (i, 0))),
        compiler_params=pltpu.CompilerParams(
            dimension_semantics=("parallel",)),
    )(tok_bf16, feat_bf16, w_pad_bf16, b_pad.reshape(1, v).astype(jnp.float32))
    return out[:m]


# ------------------------------- Model -------------------------------------

class PocketDesignPallas:
    """Forward pass of Pocket_Design with deterministic synthetic parameters."""

    def __init__(self, hidden_channels, protein_atom_feature_dim,
                 ligand_atom_feature_dim, key):
        H = hidden_channels
        self.H = H
        self.vocab = VOCAB
        ks = jax.random.split(key, 8)
        s = 0.02
        # nn.Embedding(protein_atom_feature_dim, H//2 - 8)
        self.protein_atom_emb = s * jax.random.normal(ks[0], (protein_atom_feature_dim, H // 2 - 8), jnp.float32)
        # nn.Embedding(14, 8)
        self.atom_pos_embedding = s * jax.random.normal(ks[1], (14, 8), jnp.float32)
        # nn.Embedding(21, H//2 - 16)
        self.residue_embedding = s * jax.random.normal(ks[2], (21, H // 2 - 16), jnp.float32)
        # nn.Linear(ligand_atom_feature_dim, H) — tiny; handled by XLA (no Pallas)
        self.ligand_W = s * jax.random.normal(ks[3], (ligand_atom_feature_dim, H), jnp.float32)
        self.ligand_b = jnp.zeros((H,), jnp.float32)
        # surrogate encoder weights (bf16 MXU operands; bias / epilogue f32)
        self.enc_W = (s * jax.random.normal(ks[4], (H, H), jnp.float32)).astype(jnp.bfloat16)
        self.enc_b = jnp.zeros((H,), jnp.float32)
        # surrogate ESM-adapter weights; vocab padded to 128 lanes
        self.tok_emb = s * jax.random.normal(ks[5], (self.vocab, H), jnp.float32)
        esm_W = s * jax.random.normal(ks[6], (H, self.vocab), jnp.float32)
        self.esm_W_pad = (jnp.zeros((H, VOCAB_PAD), jnp.float32)
                          .at[:, :self.vocab].set(esm_W).astype(jnp.bfloat16))
        self.esm_b_pad = jnp.zeros((VOCAB_PAD,), jnp.float32)
        # RES_ATOM_TYPE lookup table [21, 14] (synthetic, deterministic)
        self.res_atom_type = (jnp.arange(21 * 14, dtype=jnp.int32).reshape(21, 14)
                              % protein_atom_feature_dim)
        # single jit over the whole device-side forward
        self._forward_jit = jax.jit(self._forward_impl,
                                    static_argnames=("batch_size", "n_mask"))

    # PositionalEncodings(16) — sinusoidal embedding of residue index
    def _pos_embed(self, res_idx, dim=16):
        i = jnp.arange(dim // 2, dtype=jnp.float32)
        freq = jnp.exp(-jnp.log(10000.0) * (2.0 * i / dim))
        ang = res_idx.astype(jnp.float32)[:, None] * freq[None, :]
        return jnp.concatenate([jnp.sin(ang), jnp.cos(ang)], axis=-1)

    def _compute_res_H(self, res_S, res_idx):
        n = res_S.shape[0]
        atom_emb = self.protein_atom_emb[self.res_atom_type[res_S]]                  # [N,14,H/2-8]
        atom_pos_emb = jnp.broadcast_to(self.atom_pos_embedding[None], (n, 14, 8))   # [N,14,8]
        res_emb = jnp.repeat(self.residue_embedding[res_S][:, None, :], 14, axis=1)  # [N,14,H/2-16]
        res_pos_emb = jnp.repeat(self._pos_embed(res_idx)[:, None, :], 14, axis=1)   # [N,14,16]
        res_H = jnp.concatenate([atom_emb, atom_pos_emb, res_emb, res_pos_emb], axis=-1)
        # zero-pad the 14-atom axis to 16; pad rows MUST stay exactly zero (the kernel's
        # "- 2*relu(b)" pad correction relies on it).
        pad = jnp.zeros((n, ATOM_PAD - 14, self.H), jnp.float32)
        return jnp.concatenate([res_H, pad], axis=1)                                 # [N,16,H]

    def _initialize_res_X(self, batch, residue_mask, key):
        res_X = batch['residue_pos']                                                 # [N,14,3]
        # TODO(synk): interpolation_init_new (external backbone interpolation helper) not reproduced.
        noise = 0.1 * jax.random.normal(key, (res_X.shape[0], 10, 3), jnp.float32)
        sidechain = res_X[:, 1:2, :] + noise              # pos[1] repeated 10x + 0.1*randn
        new_tail = jnp.where(residue_mask[:, None, None], sidechain, res_X[:, 4:, :])
        return jnp.concatenate([res_X[:, :4, :], new_tail], axis=1)

    def _init_state(self, batch, key):
        k_lig, k_res = jax.random.split(key)
        residue_mask = batch['small_pocket_residue_mask']
        label_ligand = batch['ligand_pos']
        pred_ligand = label_ligand + 0.5 * jax.random.normal(k_lig, label_ligand.shape, jnp.float32)
        res_X = self._initialize_res_X(batch, residue_mask, k_res)
        res_S = batch['amino_acid_processed']
        # ligand linear: [B,NL,16] @ [16,H] — far below MXU scale; let XLA fuse it.
        ligand_feat = jnp.dot(batch['ligand_feat'], self.ligand_W) + self.ligand_b
        res_H = self._compute_res_H(res_S, batch['res_idx'])
        return (res_H, res_X, res_S, batch['amino_acid_batch'], pred_ligand,
                ligand_feat, batch['ligand_mask'], batch['edit_residue_num'], residue_mask)

    # public entry: host-side static extraction, then a single jitted device program
    def forward(self, batch, key):
        batch_size = int(jnp.max(batch['amino_acid_batch'])) + 1   # concrete (pre-jit)
        n_mask = int(jnp.sum(batch['full_seq_mask']))              # concrete (pre-jit)
        return self._forward_jit(batch, key, batch_size=batch_size, n_mask=n_mask)

    def _forward_impl(self, batch, key, *, batch_size, n_mask):
        (res_H, res_X, res_S, res_batch, pred_ligand, ligand_feat, ligand_mask,
         edit_residue_num, residue_mask) = self._init_state(batch, key)

        # --- surrogate encoder + h_residue = res_H.sum(-2), fused & gridded Pallas kernel ---
        # TODO(synk): real encoder is get_encoder(config.encoder) (equivariant GNN);
        # surrogate: per-atom residual ReLU-MLP, geometry passthrough.
        h_residue = fused_encoder_sum(res_H, self.enc_W, self.enc_b)   # [N_res, H] f32
        ligand_pos = pred_ligand

        L = batch['full_seq_with_masked_tokens'].shape[1]
        n_res = h_residue.shape[0]
        BL = batch_size * L

        # Instead of materializing feats[B*L, H] (mostly zeros), build a cheap int32
        # flat-row -> residue-index map (row-major order of the large-pocket mask),
        # then gather only the rows we actually need.
        flat_lp_mask = batch['large_pocket_mask'].reshape(-1)
        lp_idx = jnp.nonzero(flat_lp_mask, size=n_res, fill_value=BL + 1)[0]   # OOB fill -> dropped
        row_to_res = (jnp.full((BL + 1,), n_res, jnp.int32)
                      .at[lp_idx].set(jnp.arange(n_res, dtype=jnp.int32), mode='drop'))

        # masked (to-design) rows — the only rows whose logits are consumed
        flat_fs_mask = batch['full_seq_mask'].reshape(-1)
        m_pad = max(8, _round_up(max(n_mask, 1), 8))
        fs_idx = jnp.nonzero(flat_fs_mask, size=m_pad, fill_value=BL)[0]       # pad rows -> index BL

        # structural feature per needed row: h_residue[j] if the row is a large-pocket row, else 0
        h_res_ext = jnp.concatenate(
            [h_residue, jnp.zeros((1, self.H), jnp.float32)], axis=0)          # [n_res+1, H]
        feat_rows = h_res_ext[row_to_res[fs_idx]]                              # [m_pad, H]

        # token embedding per needed row
        init_pred_flat = batch['full_seq_with_masked_tokens'].reshape(-1)
        tok_ids = jnp.take(init_pred_flat, jnp.minimum(fs_idx, BL - 1))        # pad rows: any valid id
        tok_rows = self.tok_emb[tok_ids]                                       # [m_pad, H]

        # --- surrogate ESM adapter: (tok + feats) -> padded-vocab projection, fs rows only ---
        # TODO(synk): real ESM2-with-structural-adapter is a pretrained transformer over the
        # full sequence; this row-local surrogate makes the fs-row-only computation exact
        # for the surrogate but not for the real model.
        logits_pad = fused_esm_logits(tok_rows.astype(jnp.bfloat16),
                                      feat_rows.astype(jnp.bfloat16),
                                      self.esm_W_pad, self.esm_b_pad)          # [m_pad, 128]

        # pred_res_type = decode_logits[full_seq_mask][:, 4:24]
        pred_res_type = logits_pad[:n_mask, 4:24]

        return res_X, ligand_pos, pred_res_type


# ------------------------------- Driver -------------------------------------

if __name__ == "__main__":
    key = jax.random.PRNGKey(0)
    k_batch, k_model, k_fwd = jax.random.split(key, 3)

    B = 2                      # protein/ligand complexes in the batch
    n_res_per_batch = 4
    N_res = B * n_res_per_batch
    N_lig = 8                  # ligand atoms per complex
    L_seq = 16                 # full-sequence length fed to the ESM adapter
    H = 128                    # hidden_channels (56 + 8 + 48 + 16 = 128)
    protein_atom_feature_dim = 38
    ligand_atom_feature_dim = 16

    ks = jax.random.split(k_batch, 6)
    residue_pos = jax.random.normal(ks[0], (N_res, 14, 3), jnp.float32)
    backbone_pos = residue_pos[:, :4, :]
    amino_acid = jax.random.randint(ks[1], (N_res,), 1, 21)          # 1..20
    amino_acid_processed = amino_acid % 21                           # 0..20 indices
    res_idx = jnp.tile(jnp.arange(n_res_per_batch, dtype=jnp.int32), B)
    amino_acid_batch = jnp.repeat(jnp.arange(B, dtype=jnp.int32), n_res_per_batch)
    small_pocket_residue_mask = jnp.tile(jnp.array([True, True, False, False]), B)
    ligand_pos = jax.random.normal(ks[2], (B, N_lig, 3), jnp.float32)
    ligand_feat_raw = jax.random.normal(ks[3], (B, N_lig, ligand_atom_feature_dim), jnp.float32)
    ligand_mask = jnp.ones((B, N_lig), jnp.bool_)
    edit_residue_num = jnp.full((B,), 2, jnp.int32)

    # large-pocket residues occupy positions 2..5 of each per-complex sequence row
    large_pocket_mask = jnp.zeros((B, L_seq), jnp.bool_).at[:, 2:2 + n_res_per_batch].set(True)
    # masked (to-design) positions = first two large-pocket residues of each row
    full_seq_mask = jnp.zeros((B, L_seq), jnp.bool_).at[:, 2:4].set(True)
    full_seq = jax.random.randint(ks[4], (B, L_seq), 4, 24)
    full_seq_with_masked_tokens = jnp.where(full_seq_mask, 32, full_seq)   # 32 = <mask>

    batch = dict(
        residue_pos=residue_pos, backbone_pos=backbone_pos,
        amino_acid=amino_acid, amino_acid_processed=amino_acid_processed,
        amino_acid_batch=amino_acid_batch, res_idx=res_idx,
        small_pocket_residue_mask=small_pocket_residue_mask,
        ligand_pos=ligand_pos, ligand_feat=ligand_feat_raw, ligand_mask=ligand_mask,
        edit_residue_num=edit_residue_num,
        full_seq_with_masked_tokens=full_seq_with_masked_tokens,
        full_seq_mask=full_seq_mask, large_pocket_mask=large_pocket_mask,
    )

    model = PocketDesignPallas(H, protein_atom_feature_dim, ligand_atom_feature_dim, k_model)
    res_X, lig_pos_out, pred_res_type = model.forward(batch, k_fwd)
    jax.block_until_ready((res_X, lig_pos_out, pred_res_type))

    assert res_X.shape == (N_res, 14, 3)
    assert lig_pos_out.shape == (B, N_lig, 3)
    assert pred_res_type.shape == (int(full_seq_mask.sum()), 20)
    print("KERNEL_OK")
</pallas_src>

<mosaic_0001>
module attributes {stable_mosaic.version = 11 : i64} {
  func.func @_encoder_sum_kernel(%arg0: i32, %arg1: memref<8x16x128xbf16, #tpu.memory_space<vmem>>, %arg2: memref<128x128xbf16, #tpu.memory_space<vmem>>, %arg3: memref<1x128xf32, #tpu.memory_space<vmem>>, %arg4: memref<8x128xf32, #tpu.memory_space<vmem>>) attributes {dimension_semantics = [#tpu.dimension_semantics<parallel>], iteration_bounds = array<i64: 1>, scalar_prefetch = 0 : i64, scratch_operands = 0 : i64, tpu.core_type = #tpu.core_type<tc>, window_params = [{transform_indices = @transform_0, window_bounds = array<i64: 8, 16, 128>}, {pipeline_mode = #tpu.pipeline_mode<synchronous>, transform_indices = @transform_1, window_bounds = array<i64: 128, 128>}, {pipeline_mode = #tpu.pipeline_mode<synchronous>, transform_indices = @transform_2, window_bounds = array<i64: 1, 128>}, {transform_indices = @transform_3, window_bounds = array<i64: 8, 128>}]} {
    %c0 = arith.constant 0 : index
    %c0_0 = arith.constant 0 : index
    %c0_1 = arith.constant 0 : index
    %0 = vector.load %arg1[%c0, %c0_0, %c0_1] : memref<8x16x128xbf16, #tpu.memory_space<vmem>>, vector<8x16x128xbf16>
    %1 = vector.shape_cast %0 : vector<8x16x128xbf16> to vector<128x128xbf16>
    %c0_2 = arith.constant 0 : index
    %c0_3 = arith.constant 0 : index
    %2 = vector.load %arg2[%c0_2, %c0_3] : memref<128x128xbf16, #tpu.memory_space<vmem>>, vector<128x128xbf16>
    %cst = arith.constant dense<0.000000e+00> : vector<128x128xf32>
    %3 = tpu.matmul %1, %2, %cst {dimension_numbers = #tpu.dot_dimension_numbers<[1], [0], [0], [1], [0, 0, 1, 1], [], []>} : vector<128x128xbf16>, vector<128x128xbf16>, vector<128x128xf32> -> vector<128x128xf32>
    %c0_4 = arith.constant 0 : index
    %c0_5 = arith.constant 0 : index
    %4 = vector.load %arg3[%c0_4, %c0_5] : memref<1x128xf32, #tpu.memory_space<vmem>>, vector<1x128xf32>
    %5 = vector.broadcast %4 : vector<1x128xf32> to vector<128x128xf32>
    %6 = arith.addf %3, %5 : vector<128x128xf32>
    %7 = arith.extf %1 : vector<128x128xbf16> to vector<128x128xf32>
    %cst_6 = arith.constant 0.000000e+00 : f32
    %8 = vector.broadcast %cst_6 : f32 to vector<128x128xf32>
    %9 = arith.maximumf %6, %8 : vector<128x128xf32>
    %10 = arith.addf %7, %9 : vector<128x128xf32>
    %11 = vector.shape_cast %10 : vector<128x128xf32> to vector<8x16x128xf32>
    %cst_7 = arith.constant dense<0.000000e+00> : vector<8x128xf32>
    %12 = vector.multi_reduction <add>, %11, %cst_7 [1] : vector<8x16x128xf32> to vector<8x128xf32>
    %c0_8 = arith.constant 0 : index
    %c0_9 = arith.constant 0 : index
    %13 = vector.load %arg3[%c0_8, %c0_9] : memref<1x128xf32, #tpu.memory_space<vmem>>, vector<1x128xf32>
    %cst_10 = arith.constant 0.000000e+00 : f32
    %14 = vector.broadcast %cst_10 : f32 to vector<1x128xf32>
    %15 = arith.maximumf %13, %14 : vector<1x128xf32>
    %cst_11 = arith.constant 2.000000e+00 : f32
    %16 = vector.broadcast %cst_11 : f32 to vector<1x128xf32>
    %17 = arith.mulf %16, %15 : vector<1x128xf32>
    %18 = vector.broadcast %17 : vector<1x128xf32> to vector<8x128xf32>
    %19 = arith.subf %12, %18 : vector<8x128xf32>
    %c0_12 = arith.constant 0 : index
    %c0_13 = arith.constant 0 : index
    %20 = vector.load %arg4[%c0_12, %c0_13] : memref<8x128xf32, #tpu.memory_space<vmem>>, vector<8x128xf32>
    tpu.vector_store %arg4[%c0_12, %c0_13], %19 {strides = array<i32>} : memref<8x128xf32, #tpu.memory_space<vmem>>, vector<8x128xf32>,
    return
  }
  func.func @transform_0(%arg0: i32) -> (i32, i32, i32) {
    %c0_i32 = arith.constant 0 : i32
    %c0_i32_0 = arith.constant 0 : i32
    %c0_i32_1 = arith.constant 0 : i32
    return %arg0, %c0_i32, %c0_i32_0 : i32, i32, i32
  }
  func.func @transform_1(%arg0: i32) -> (i32, i32) {
    %c0_i32 = arith.constant 0 : i32
    %c0_i32_0 = arith.constant 0 : i32
    %c0_i32_1 = arith.constant 0 : i32
    return %c0_i32, %c0_i32_0 : i32, i32
  }
  func.func @transform_2(%arg0: i32) -> (i32, i32) {
    %c0_i32 = arith.constant 0 : i32
    %c0_i32_0 = arith.constant 0 : i32
    %c0_i32_1 = arith.constant 0 : i32
    return %c0_i32, %c0_i32_0 : i32, i32
  }
  func.func @transform_3(%arg0: i32) -> (i32, i32) {
    %c0_i32 = arith.constant 0 : i32
    %c0_i32_0 = arith.constant 0 : i32
    return %arg0, %c0_i32 : i32, i32
  }
}

module attributes {stable_mosaic.version = 11 : i64} {
  func.func @_esm_logits_kernel(%arg0: i32, %arg1: memref<8x128xbf16, #tpu.memory_space<vmem>>, %arg2: memref<8x128xbf16, #tpu.memory_space<vmem>>, %arg3: memref<128x128xbf16, #tpu.memory_space<vmem>>, %arg4: memref<1x128xf32, #tpu.memory_space<vmem>>, %arg5: memref<8x128xf32, #tpu.memory_space<vmem>>) attributes {dimension_semantics = [#tpu.dimension_semantics<parallel>], iteration_bounds = array<i64: 1>, scalar_prefetch = 0 : i64, scratch_operands = 0 : i64, tpu.core_type = #tpu.core_type<tc>, window_params = [{transform_indices = @transform_0, window_bounds = array<i64: 8, 128>}, {transform_indices = @transform_1, window_bounds = array<i64: 8, 128>}, {pipeline_mode = #tpu.pipeline_mode<synchronous>, transform_indices = @transform_2, window_bounds = array<i64: 128, 128>}, {pipeline_mode = #tpu.pipeline_mode<synchronous>, transform_indices = @transform_3, window_bounds = array<i64: 1, 128>}, {transform_indices = @transform_4, window_bounds = array<i64: 8, 128>}]} {
    %c0 = arith.constant 0 : index
    %c0_0 = arith.constant 0 : index
    %0 = vector.load %arg1[%c0, %c0_0] : memref<8x128xbf16, #tpu.memory_space<vmem>>, vector<8x128xbf16>
    %1 = arith.extf %0 : vector<8x128xbf16> to vector<8x128xf32>
    %c0_1 = arith.constant 0 : index
    %c0_2 = arith.constant 0 : index
    %2 = vector.load %arg2[%c0_1, %c0_2] : memref<8x128xbf16, #tpu.memory_space<vmem>>, vector<8x128xbf16>
    %3 = arith.extf %2 : vector<8x128xbf16> to vector<8x128xf32>
    %4 = arith.addf %1, %3 : vector<8x128xf32>
    %5 = arith.truncf %4 : vector<8x128xf32> to vector<8x128xbf16>
    %c0_3 = arith.constant 0 : index
    %c0_4 = arith.constant 0 : index
    %6 = vector.load %arg3[%c0_3, %c0_4] : memref<128x128xbf16, #tpu.memory_space<vmem>>, vector<128x128xbf16>
    %cst = arith.constant dense<0.000000e+00> : vector<8x128xf32>
    %7 = tpu.matmul %5, %6, %cst {dimension_numbers = #tpu.dot_dimension_numbers<[1], [0], [0], [1], [0, 0, 1, 1], [], []>} : vector<8x128xbf16>, vector<128x128xbf16>, vector<8x128xf32> -> vector<8x128xf32>
    %c0_5 = arith.constant 0 : index
    %c0_6 = arith.constant 0 : index
    %8 = vector.load %arg4[%c0_5, %c0_6] : memref<1x128xf32, #tpu.memory_space<vmem>>, vector<1x128xf32>
    %9 = vector.broadcast %8 : vector<1x128xf32> to vector<8x128xf32>
    %10 = arith.addf %7, %9 : vector<8x128xf32>
    %c0_7 = arith.constant 0 : index
    %c0_8 = arith.constant 0 : index
    %11 = vector.load %arg5[%c0_7, %c0_8] : memref<8x128xf32, #tpu.memory_space<vmem>>, vector<8x128xf32>
    tpu.vector_store %arg5[%c0_7, %c0_8], %10 {strides = array<i32>} : memref<8x128xf32, #tpu.memory_space<vmem>>, vector<8x128xf32>,
    return
  }
  func.func @transform_0(%arg0: i32) -> (i32, i32) {
    %c0_i32 = arith.constant 0 : i32
    %c0_i32_0 = arith.constant 0 : i32
    return %arg0, %c0_i32 : i32, i32
  }
  func.func @transform_1(%arg0: i32) -> (i32, i32) {
    %c0_i32 = arith.constant 0 : i32
    %c0_i32_0 = arith.constant 0 : i32
    return %arg0, %c0_i32 : i32, i32
  }
  func.func @transform_2(%arg0: i32) -> (i32, i32) {
    %c0_i32 = arith.constant 0 : i32
    %c0_i32_0 = arith.constant 0 : i32
    %c0_i32_1 = arith.constant 0 : i32
    return %c0_i32, %c0_i32_0 : i32, i32
  }
  func.func @transform_3(%arg0: i32) -> (i32, i32) {
    %c0_i32 = arith.constant 0 : i32
    %c0_i32_0 = arith.constant 0 : i32
    %c0_i32_1 = arith.constant 0 : i32
    return %c0_i32, %c0_i32_0 : i32, i32
  }
  func.func @transform_4(%arg0: i32) -> (i32, i32) {
    %c0_i32 = arith.constant 0 : i32
    %c0_i32_0 = arith.constant 0 : i32
    return %arg0, %c0_i32 : i32, i32
  }
}

</mosaic_0001>

<bundles_post_ra>
// kernel: _forward_impl.2
= control target key start
LH: loop header
LB: loop body
LE: loop exit
PB: predicated region body
PF: predicated region fallthrough
CT: control target
= control target key end

     0   :  { %vm321_vm0 = vcmask 1041409   ;;  %vm324_vm1 = vcmask 1042434   ;;  %vm327_vm2 = vcmask 1043459   ;;  %vm330_vm3 = vcmask 1044484   ;;  %s574_s1 = inlined_call_operand.vmem [shape: bf16[128,128], index: 1, kind: input, shape index: {}]   ;;  %s575_s0 = inlined_call_operand.vmem [shape: bf16[8,16,128], index: 0, kind: input, shape index: {}]   ;;  %s576_s2 = inlined_call_operand.vmem [shape: f32[1,128], index: 2, kind: input, shape index: {}]   ;;  %s577_s3 = inlined_call_operand.vmem [shape: f32[8,128], index: 3, kind: output, shape index: {}]  }
   0x1   :  { %v426_v0 = vld [vmem:[%s574_s1 + $0x38] sm:$0xff]  ;;  %v425_v1 = vld [vmem:[%s574_s1 + $0x30] sm:$0xff]  ;;  %v424_v2 = vld [vmem:[%s574_s1 + $0x28] sm:$0xff]  ;;  %vm333_vm4 = vcmask 1045509   ;;  %vm336_vm5 = vcmask 1046534   ;;  %vm339_vm6 = vcmask 1047559  }
   0x2   :  { %146 = vmatpush.bf16.msra.mxu0 %v426_v0  ;;  %427 = vmatpush.bf16.msra.mxu1 %v426_v0  ;;  %v423_v3 = vld [vmem:[%s574_s1 + $0x20] sm:$0xff]  ;;  %v422_v4 = vld [vmem:[%s574_s1 + $0x18] sm:$0xff]  ;;  %v421_v5 = vld [vmem:[%s574_s1 + $0x10] sm:$0xff] }
   0x3   :  { %428 = vmatpush.bf16.msra.mxu2 %v426_v0  ;;  %429 = vmatpush.bf16.msra.mxu3 %v426_v0  ;;  %v420_v6 = vld [vmem:[%s574_s1 + $0x8] sm:$0xff]  ;;  %v419_v7 = vld [vmem:[%s574_s1] sm:$0xff]  ;;  %v413_v9 = vld [vmem:[%s575_s0 + $0x10] sm:$0xff] }
   0x4   :  { %v411_v8 = vld [vmem:[%s575_s0] sm:$0xff]  ;;  %v417_v11 = vld [vmem:[%s575_s0 + $0x30] sm:$0xff]  ;;  %v412_v12 = vld [vmem:[%s575_s0 + $0x8] sm:$0xff] }
   0x5   :  { %v415_v10 = vld [vmem:[%s575_s0 + $0x20] sm:$0xff]  ;;  %v414_v13 = vld [vmem:[%s575_s0 + $0x18] sm:$0xff]  ;;  %v416_v14 = vld [vmem:[%s575_s0 + $0x28] sm:$0xff] }
   0x6   :  { %147 = vmatpush.bf16.msra.mxu0 %v425_v1  ;;  %430 = vmatpush.bf16.msra.mxu1 %v425_v1  ;;  %v418_v15 = vld [vmem:[%s575_s0 + $0x38] sm:$0xff]  ;;  %v523_v18 = vld [vmem:[%s576_s2] ss:$0 sm:$0xff]  ;;  %v18_v19 = vld [vmem:[%s575_s0 + $0x10] sm:$0xff]  }
   0x7   :  { %431 = vmatpush.bf16.msra.mxu2 %v425_v1  ;;  %432 = vmatpush.bf16.msra.mxu3 %v425_v1  ;;  %v199_v24 = vunpack.c.l.bf16 %v18_v19  ;;  %v14_v27 = vld [vmem:[%s575_s0] sm:$0xff]   ;;  %v200_v31 = vunpack.c.h.bf16 %v18_v19  ;;  %v26_v42 = vld [vmem:[%s575_s0 + $0x30] sm:$0xff]   ;;  %v16_v1 = vld [vmem:[%s575_s0 + $0x8] sm:$0xff]  }
   0x8   :  { %v196_v32 = vunpack.c.h.bf16 %v14_v27  ;;  %v195_v35 = vunpack.c.l.bf16 %v14_v27  ;;  %v22_v37 = vld [vmem:[%s575_s0 + $0x20] sm:$0xff]   ;;  %v208_v49 = vunpack.c.h.bf16 %v26_v42  ;;  %v207_v56 = vunpack.c.l.bf16 %v26_v42 }
   0x9   :  { %v203_v44 = vunpack.c.l.bf16 %v22_v37  ;;  %v204_v47 = vunpack.c.h.bf16 %v22_v37 }
   0xa   :  { %148 = vmatpush.bf16.msra.mxu0 %v424_v2  ;;  %433 = vmatpush.bf16.msra.mxu1 %v424_v2 }
   0xb   :  { %434 = vmatpush.bf16.msra.mxu2 %v424_v2  ;;  %435 = vmatpush.bf16.msra.mxu3 %v424_v2 }
   0xe   :  { %149 = vmatpush.bf16.msra.mxu0 %v423_v3  ;;  %436 = vmatpush.bf16.msra.mxu1 %v423_v3 }
   0xf   :  { %437 = vmatpush.bf16.msra.mxu2 %v423_v3  ;;  %438 = vmatpush.bf16.msra.mxu3 %v423_v3 }
  0x12   :  { %150 = vmatpush.bf16.msra.mxu0 %v422_v4  ;;  %439 = vmatpush.bf16.msra.mxu1 %v422_v4 }
  0x13   :  { %440 = vmatpush.bf16.msra.mxu2 %v422_v4  ;;  %441 = vmatpush.bf16.msra.mxu3 %v422_v4  ;;  %v20_v4 = vld [vmem:[%s575_s0 + $0x18] sm:$0xff]  }
  0x16   :  { %151 = vmatpush.bf16.msra.mxu0 %v421_v5  ;;  %442 = vmatpush.bf16.msra.mxu1 %v421_v5 }
  0x17   :  { %443 = vmatpush.bf16.msra.mxu2 %v421_v5  ;;  %444 = vmatpush.bf16.msra.mxu3 %v421_v5 }
  0x1a   :  { %152 = vmatpush.bf16.msra.mxu0 %v420_v6  ;;  %445 = vmatpush.bf16.msra.mxu1 %v420_v6 }
  0x1b   :  { %446 = vmatpush.bf16.msra.mxu2 %v420_v6  ;;  %447 = vmatpush.bf16.msra.mxu3 %v420_v6 }
  0x1e   :  { %153 = vmatpush.bf16.msra.mxu0 %v419_v7  ;;  %448 = vmatpush.bf16.msra.mxu1 %v419_v7 }
  0x1f   :  { %449 = vmatpush.bf16.msra.mxu2 %v419_v7  ;;  %450 = vmatpush.bf16.msra.mxu3 %v419_v7 }
  0x21   :  { %154 = vmatmul.bf16.vlgmr.msra.gmra.mxu0 %v411_v8  ;;  %164 = vmatmul.bf16.vlgmr.msra.gmra.mxu1 %v413_v9  ;;  %v46_v8 = vld [vmem:[%s576_s2] sm:$0x1] }
  0x22   :  { %174 = vmatmul.bf16.vlgmr.msra.gmra.mxu2 %v415_v10  ;;  %184 = vmatmul.bf16.vlgmr.msra.gmra.mxu3 %v417_v11  ;;  %v197_v11 = vunpack.c.l.bf16 %v16_v1  ;;  %v299_v27 = vmax.f32 %v46_v8, 0.0 }
  0x31   :  { %159 = vmatmul.bf16.gmra.mxu0 %v412_v12  ;;  %169 = vmatmul.bf16.gmra.mxu1 %v414_v13 }
  0x32   :  { %179 = vmatmul.bf16.gmra.mxu2 %v416_v14  ;;  %189 = vmatmul.bf16.gmra.mxu3 %v418_v15  ;;  %v201_v15 = vunpack.c.l.bf16 %v20_v4 }
  0x9e   :  { %v155_v16 = vpop.f32.mrf.mxu0  ;;  %v165_v17 = vpop.f32.mrf.mxu1 }
  0x9f   :  { %v166_v20 = vadd.f32 %v523_v18, %v165_v17  ;;  %v156_v23 = vadd.f32 %v523_v18, %v155_v16  ;;  %v198_v17 = vunpack.c.h.bf16 %v16_v1 }
  0xa1   :  { %v215_v28 = vmax.f32 %v166_v20, 0.0  ;;  %v211_v36 = vmax.f32 %v156_v23, 0.0  ;;  %v202_v20 = vunpack.c.h.bf16 %v20_v4  ;;  %v24_v23 = vld [vmem:[%s575_s0 + $0x28] sm:$0xff]  }
  0xa3   :  { %v231_v39 = vadd.f32 %v215_v28, %v199_v24  ;;  %v227_v50 = vadd.f32 %v211_v36, %v195_v35  ;;  %v28_v28 = vld [vmem:[%s575_s0 + $0x38] sm:$0xf]  ;;  %v205_v36 = vunpack.c.l.bf16 %v24_v23 }
  0xa5   :  { %v175_v21 = vpop.f32.mrf.mxu2  ;;  %v185_v22 = vpop.f32.mrf.mxu3 }
  0xa6   :  { %v157_v25 = vpop.f32.mrf.mxu0  ;;  %v167_v26 = vpop.f32.mrf.mxu1  ;;  %v176_v38 = vadd.f32 %v523_v18, %v175_v21  ;;  %v186_v40 = vadd.f32 %v523_v18, %v185_v22 }
  0xa7   :  { %v158_v29 = vadd.f32 %v523_v18, %v157_v25  ;;  %v168_v30 = vadd.f32 %v523_v18, %v167_v26 }
  0xa8   :  { %v219_v51 = vmax.f32 %v176_v38, 0.0  ;;  %v223_v57 = vmax.f32 %v186_v40, 0.0 }
  0xa9   :  { %v212_v33 = vmax.f32 %v158_v29, 0.0  ;;  %v216_v34 = vmax.f32 %v168_v30, 0.0 }
  0xaa   :  { %v235_v62 = vadd.f32 %v219_v51, %v203_v44  ;;  %v239_v3 = vadd.f32 %v223_v57, %v207_v56  ;;  %v206_v44 = vunpack.c.h.bf16 %v24_v23 }
  0xab   :  { %v232_v41 = vadd.f32 %v216_v34, %v200_v31  ;;  %v228_v43 = vadd.f32 %v212_v33, %v196_v32  ;;  %v29_v33 = vld [vmem:[%s575_s0 + $0x3c] sm:$0xf] }
  0xad   :  { %v257_v45 = vadd.f32 %v232_v41, %v231_v39  ;;  %v177_v46 = vpop.f32.mrf.mxu2  ;;  %v187_v48 = vpop.f32.mrf.mxu3  ;;  %v243_v58 = vadd.f32 %v228_v43, %v227_v50  ;;  %v209_v43 = vunpack.c.l.bf16 %v28_v28 }
  0xae   :  { %v178_v52 = vadd.f32 %v523_v18, %v177_v46  ;;  %v188_v53 = vadd.f32 %v523_v18, %v187_v48  ;;  %v160_v54 = vpop.f32.mrf.mxu0  ;;  %v170_v55 = vpop.f32.mrf.mxu1 }
  0xaf   :  { %v258_v61 = vrot.slane %v257_v45, 4  ;;  %v161_v2 = vadd.f32 %v523_v18, %v160_v54  ;;  %v171_v5 = vadd.f32 %v523_v18, %v170_v55  ;;  %v244_v6 = vrot.slane %v243_v58, 4 }
  0xb0   :  { %v220_v59 = vmax.f32 %v178_v52, 0.0  ;;  %v224_v60 = vmax.f32 %v188_v53, 0.0 }
  0xb1   :  { %v259_v9 = vadd.f32 %v258_v61, %v257_v45  ;;  %v213_v14 = vmax.f32 %v161_v2, 0.0  ;;  %v217_v22 = vmax.f32 %v171_v5, 0.0  ;;  %v245_v26 = vadd.f32 %v244_v6, %v243_v58 }
  0xb2   :  { %v236_v63 = vadd.f32 %v220_v59, %v204_v47  ;;  %v240_v0 = vadd.f32 %v224_v60, %v208_v49  ;;  %v210_v45 = vunpack.c.l.bf16 %v29_v33  ;;  %v300_v60 = vmul.f32 2.0, %v299_v27 }
  0xb3   :  { %v260_v29 = vrot.slane %v259_v9, 2  ;;  %v229_v34 = vadd.f32 %v213_v14, %v197_v11  ;;  %v233_v39 = vadd.f32 %v217_v22, %v201_v15  ;;  %v246_v42 = vrot.slane %v245_v26, 2 }
  0xb4   :  { %v271_v7 = vadd.f32 %v236_v63, %v235_v62  ;;  %v285_v10 = vadd.f32 %v240_v0, %v239_v3  ;;  %v302_v15 = vperm.slane %v300_v60, 0 }
  0xb5   :  { %v180_v12 = vpop.f32.mrf.mxu2  ;;  %v190_v13 = vpop.f32.mrf.mxu3  ;;  %v261_v46 = vadd.f32 %v260_v29, %v259_v9  ;;  %v247_v59 = vadd.f32 %v246_v42, %v245_v26 }
  0xb6   :  { %v162_v16 = vpop.f32.mrf.mxu0  ;;  %v172_v19 = vpop.f32.mrf.mxu1  ;;  %v272_v21 = vrot.slane %v271_v7, 4  ;;  %v286_v30 = vrot.slane %v285_v10, 4  ;;  %v181_v35 = vadd.f32 %v523_v18, %v180_v12  ;;  %v191_v37 = vadd.f32 %v523_v18, %v190_v13 }
  0xb7   :  { %v163_v24 = vadd.f32 %v523_v18, %v162_v16  ;;  %v173_v25 = vadd.f32 %v523_v18, %v172_v19  ;;  %v262_v63 = vrot.slane %v261_v46, 1  ;;  %v248_v11 = vrot.slane %v247_v59, 1 }
  0xb8   :  { %v273_v38 = vadd.f32 %v272_v21, %v271_v7  ;;  %v287_v47 = vadd.f32 %v286_v30, %v285_v10  ;;  %v221_v52 = vmax.f32 %v181_v35, 0.0  ;;  %v225_v53 = vmax.f32 %v191_v37, 0.0 }
  0xb9   :  { %v214_v31 = vmax.f32 %v163_v24, 0.0  ;;  %v218_v32 = vmax.f32 %v173_v25, 0.0  ;;  %v263_v16 = vadd.f32 %v262_v63, %v261_v46  ;;  %v249_v25 = vadd.f32 %v248_v11, %v247_v59 }
  0xba   :  { %v274_v56 = vrot.slane %v273_v38, 2  ;;  %v288_v0 = vrot.slane %v287_v47, 2  ;;  %v237_v3 = vadd.f32 %v221_v52, %v205_v36  ;;  %v241_v4 = vadd.f32 %v225_v53, %v209_v43 }
  0xbb   :  { %v230_v40 = vadd.f32 %v214_v31, %v198_v17  ;;  %v234_v41 = vadd.f32 %v218_v32, %v202_v20  ;;  %v306_v29 = vsub.f32 %v263_v16, %v302_v15  ;;  %v304_v37 = vsub.f32 %v249_v25, %v302_v15 }
  0xbc   :  { %v275_v7 = vadd.f32 %v274_v56, %v273_v38  ;;  %v289_v12 = vadd.f32 %v288_v0, %v287_v47 }
  0xbd   :  { %v250_v48 = vadd.f32 %v230_v40, %v229_v34  ;;  %v264_v49 = vadd.f32 %v234_v41, %v233_v39  ;;  %v182_v50 = vpop.f32.mrf.mxu2  ;;  %v192_v51 = vpop.f32.mrf.mxu3  ;;  %v323_v40 = vrot.slane %v306_v29, 6 }
  0xbe   :  { %v183_v54 = vadd.f32 %v523_v18, %v182_v50  ;;  %v193_v55 = vadd.f32 %v523_v18, %v192_v51  ;;  %v276_v20 = vrot.slane %v275_v7, 1  ;;  %v290_v26 = vrot.slane %v289_v12, 1 }
  0xbf   :  { %v251_v57 = vrot.slane %v250_v48, 4  ;;  %v265_v58 = vrot.slane %v264_v49, 4 }
  0xc0   :  { %v222_v61 = vmax.f32 %v183_v54, 0.0  ;;  %v226_v62 = vmax.f32 %v193_v55, 0.0  ;;  %v277_v32 = vadd.f32 %v276_v20, %v275_v7  ;;  %v291_v38 = vadd.f32 %v290_v26, %v289_v12 }
  0xc1   :  { %v252_v1 = vadd.f32 %v251_v57, %v250_v48  ;;  %v266_v2 = vadd.f32 %v265_v58, %v264_v49 }
  0xc2   :  { %v238_v5 = vadd.f32 %v222_v61, %v206_v44  ;;  %v242_v6 = vadd.f32 %v226_v62, %v210_v45  ;;  %v308_v43 = vsub.f32 %v277_v32, %v302_v15  ;;  %v310_v49 = vsub.f32 %v291_v38, %v302_v15 }
  0xc3   :  { %v253_v8 = vrot.slane %v252_v1, 2  ;;  %v267_v9 = vrot.slane %v266_v2, 2 }
  0xc4   :  { %v278_v10 = vadd.f32 %v238_v5, %v237_v3  ;;  %v292_v18 = vadd.f32 %v242_v6, %v241_v4  ;;  %v329_v53 = vrot.slane %v308_v43, 4  ;;  %v335_v55 = vrot.slane %v310_v49, 2 }
  0xc5   :  { %v254_v13 = vadd.f32 %v253_v8, %v252_v1  ;;  %v268_v14 = vadd.f32 %v267_v9, %v266_v2 }
  0xc6   :  { %v279_v17 = vrot.slane %v278_v10, 4  ;;  %v293_v19 = vrot.slane %v292_v18, 4 }
  0xc7   :  { %v255_v21 = vrot.slane %v254_v13, 1  ;;  %v269_v22 = vrot.slane %v268_v14, 1 }
  0xc8   :  { %v280_v23 = vadd.f32 %v279_v17, %v278_v10  ;;  %v294_v24 = vadd.f32 %v293_v19, %v292_v18 }
  0xc9   :  { %v256_v27 = vadd.f32 %v255_v21, %v254_v13  ;;  %v270_v28 = vadd.f32 %v269_v22, %v268_v14 }
  0xca   :  { %v281_v30 = vrot.slane %v280_v23, 2  ;;  %v295_v31 = vrot.slane %v294_v24, 2 }
  0xcb   :  { %v305_v33 = vsub.f32 %v256_v27, %v302_v15  ;;  %v307_v34 = vsub.f32 %v270_v28, %v302_v15 }
  0xcc   :  { %v282_v35 = vadd.f32 %v281_v30, %v280_v23  ;;  %v296_v36 = vadd.f32 %v295_v31, %v294_v24 }
  0xcd   :  { %v320_v39 = vrot.slane %v305_v33, 7  ;;  %v326_v46 = vrot.slane %v307_v34, 5 }
  0xce   :  { %v283_v41 = vrot.slane %v282_v35, 1  ;;  %v297_v42 = vrot.slane %v296_v36, 1 }
  0xcf   :  { %v322_v44 = vsel %vm321_vm0, %v320_v39, %v304_v37 }
  0xd0   :  { %v325_v45 = vsel %vm324_vm1, %v323_v40, %v322_v44  ;;  %v284_v47 = vadd.f32 %v283_v41, %v282_v35  ;;  %v298_v48 = vadd.f32 %v297_v42, %v296_v36 }
  0xd1   :  { %v328_v50 = vsel %vm327_vm2, %v326_v46, %v325_v45 }
  0xd2   :  { %v309_v51 = vsub.f32 %v284_v47, %v302_v15  ;;  %v311_v52 = vsub.f32 %v298_v48, %v302_v15  ;;  %v331_v56 = vsel %vm330_vm3, %v329_v53, %v328_v50 }
  0xd4   :  { %v332_v54 = vrot.slane %v309_v51, 3  ;;  %v338_v58 = vrot.slane %v311_v52, 1 }
  0xd6   :  { %v334_v57 = vsel %vm333_vm4, %v332_v54, %v331_v56 }
  0xd7   :  { %v337_v59 = vsel %vm336_vm5, %v335_v55, %v334_v57 }
  0xd8   :  { %v340_v60 = vsel %vm339_vm6, %v338_v58, %v337_v59 }
  0xd9   :  { %342 = vst [vmem:[%s577_s3] sm:$0xff] %v340_v60 }

// kernel: _forward_impl.3
= control target key start
LH: loop header
LB: loop body
LE: loop exit
PB: predicated region body
PF: predicated region fallthrough
CT: control target
= control target key end

     0   :  { %s211_s2 = inlined_call_operand.vmem [shape: bf16[128,128], index: 2, kind: input, shape index: {}]   ;;  %s212_s3 = inlined_call_operand.vmem [shape: f32[1,128], index: 3, kind: input, shape index: {}]   ;;  %s213_s0 = inlined_call_operand.vmem [shape: bf16[8,128], index: 0, kind: input, shape index: {}]   ;;  %s214_s1 = inlined_call_operand.vmem [shape: bf16[8,128], index: 1, kind: input, shape index: {}]   ;;  %s215_s4 = inlined_call_operand.vmem [shape: f32[8,128], index: 4, kind: output, shape index: {}]  }
   0x1   :  { %v148_v0 = vld [vmem:[%s211_s2 + $0x38] sm:$0xff]  ;;  %v147_v1 = vld [vmem:[%s211_s2 + $0x30] sm:$0xff]  ;;  %v146_v2 = vld [vmem:[%s211_s2 + $0x28] sm:$0xff] }
   0x2   :  { %91 = vmatpush.bf16.msra.mxu0 %v148_v0  ;;  %v145_v3 = vld [vmem:[%s211_s2 + $0x20] sm:$0xff]  ;;  %v144_v4 = vld [vmem:[%s211_s2 + $0x18] sm:$0xff]  ;;  %v143_v5 = vld [vmem:[%s211_s2 + $0x10] sm:$0xff] }
   0x3   :  { %v17_v6 = vld [vmem:[%s213_s0] sm:$0xf]  ;;  %v142_v10 = vld [vmem:[%s211_s2 + $0x8] sm:$0xff] }
   0x4   :  { %v19_v7 = vld [vmem:[%s214_s1] sm:$0xf]  ;;  %v18_v8 = vunpack.c.l.bf16 %v17_v6 }
   0x5   :  { %v20_v9 = vunpack.c.l.bf16 %v19_v7  ;;  %v141_v12 = vld [vmem:[%s211_s2] sm:$0xff] }
   0x6   :  { %92 = vmatpush.bf16.msra.mxu0 %v147_v1  ;;  %v149_v14 = vld [vmem:[%s212_s3] ss:$0 sm:$0xff] }
   0x7   :  { %v21_v11 = vadd.f32 %v20_v9, %v18_v8 }
   0x9   :  { %v22_v13 = vpack.c.bf16 %v21_v11, %v21_v11 }
   0xa   :  { %93 = vmatpush.bf16.msra.mxu0 %v146_v2 }
   0xe   :  { %94 = vmatpush.bf16.msra.mxu0 %v145_v3 }
  0x12   :  { %95 = vmatpush.bf16.msra.mxu0 %v144_v4 }
  0x16   :  { %96 = vmatpush.bf16.msra.mxu0 %v143_v5 }
  0x1a   :  { %97 = vmatpush.bf16.msra.mxu0 %v142_v10 }
  0x1e   :  { %98 = vmatpush.bf16.msra.mxu0 %v141_v12 }
  0x21   :  { %99 = vmatmul.bf16.vlgmr.msra.gmra.mxu0 %v22_v13 }
  0x9e   :  { %v100_v15 = vpop.f32.mrf.mxu0 }
  0x9f   :  { %v101_v16 = vadd.f32 %v149_v14, %v100_v15 }
  0xa1   :  { %104 = vst [vmem:[%s215_s4] sm:$0xff] %v101_v16 }
  0xa6   :  { %v102_v17 = vpop.f32.mrf.mxu0 }

</bundles_post_ra>
